<compile_context>
chip_gen: v7x
topology: tpu7x:2x2x1
jax: 0.10.0
libtpu: 0.0.40
codegen_flags: <defaults>
</compile_context>

<pallas_src>
import jax
import jax.numpy as jnp
from jax.experimental import pallas as pl
from jax.experimental.pallas import tpu as pltpu


_TARGET_BLOCK_BYTES = 4 << 20     # ~4 MiB per block (review: 2-4 MiB sweet spot)
_MAX_LANES = 8192                 # widest lane dim worth using
_MIN_PALLAS_BYTES = 32 * 1024     # below this, fixed pallas_call overhead dominates


def _sublane_multiple(dtype) -> int:
    # Minimum second-minor tile per dtype width (f32: 8, bf16: 16, int8/fp8: 32).
    return {4: 8, 2: 16, 1: 32}.get(jnp.dtype(dtype).itemsize, 8)


def _choose_lanes(total: int, sub: int):
    """Widest multiple of 128 dividing `total`; prefer candidates giving rows >= sub.

    Returns None if no multiple of 128 divides `total` (caller pads).
    """
    cap = min(_MAX_LANES, (total // 128) * 128)
    best = None
    for cand in range(cap, 127, -128):
        if total % cand == 0:
            if best is None:
                best = cand
            if total // cand >= sub:
                return cand
    return best


def _round_up(v: int, m: int) -> int:
    return -(-v // m) * m


def _pick_tile_rows(rows: int, sub: int, bytes_per_row: int) -> int:
    """Row-tile sized to ~_TARGET_BLOCK_BYTES, multiple of `sub`, even block count."""
    base = max(sub, (_TARGET_BLOCK_BYTES // max(bytes_per_row, 1)) // sub * sub)
    if base >= rows:
        # Whole slab fits one target block: split into 2 so both v7x TensorCores
        # stream half the HBM traffic each (no-op on single-TC v5e/v6e).
        return max(sub, _round_up(pl.cdiv(rows, 2), sub))
    # Prefer a tile giving an even block count (equal split across 2 v7x TCs).
    for t in (base, base - sub, base + sub, base - 2 * sub, base + 2 * sub):
        if t >= sub and pl.cdiv(rows, t) % 2 == 0:
            return t
    return base


def _residual_block_kernel(x_ref, o_ref):
    # blocks = Identity, shortcut = Identity  ->  x + residual == 2*x ; then ReLU.
    x = x_ref[...]
    zero = jnp.zeros((), x_ref.dtype)          # dtype-matched: no weak-type promotion
    o_ref[...] = jnp.maximum(x + x, zero)


def residual_block_forward(x, in_channels, out_channels, activation="relu",
                           *, donate=False, force_pallas=False):
    """Pallas implementation of ResidualBlock.forward (Identity-block config).

    donate=True aliases the (reshaped) input buffer to the output
    (input_output_aliases={0: 0}); only legal when the caller no longer needs x.
    """
    assert activation == "relu", "only 'relu' activation wired up"
    # in_channels/out_channels only toggle whether the (Identity) shortcut is applied;
    # residual == x either way, so the math is identical.
    del in_channels, out_channels

    orig_shape = x.shape
    dtype = x.dtype
    total = x.size
    itemsize = jnp.dtype(dtype).itemsize
    sub = _sublane_multiple(dtype)

    if total == 0:
        return x
    if not force_pallas and total * itemsize < _MIN_PALLAS_BYTES:
        # Tiny tensors: plain XLA beats the fixed pallas_call + per-step overhead.
        return jnp.maximum(x + x, jnp.zeros((), dtype))

    lanes = _choose_lanes(total, sub)
    needs_pad = lanes is None
    x_flat = x.reshape(-1)
    if needs_pad:
        # Rare fallback: element count not divisible by 128. Pad with zeros
        # (relu(2*0) == 0, sliced off below). NOTE: costs an extra HBM pass.
        lanes = 128
        rows = pl.cdiv(total, lanes)
        x_flat = jnp.pad(x_flat, (0, rows * lanes - total))
    else:
        rows = total // lanes
    x2d = x_flat.reshape(rows, lanes)

    tile_rows = _pick_tile_rows(rows, sub, lanes * itemsize)
    grid = (pl.cdiv(rows, tile_rows),)   # ragged last block: Pallas masks the store

    block_bytes = tile_rows * lanes * itemsize
    # Cover in+out double-buffering (~4x block bytes) explicitly so v5e's 16 MiB
    # scoped-VMEM default never bites; stay well under v7x's 64 MiB physical VMEM.
    vmem_limit = min(48 << 20, max(16 << 20, 4 * block_bytes + (4 << 20)))

    out2d = pl.pallas_call(
        _residual_block_kernel,
        out_shape=jax.ShapeDtypeStruct((rows, lanes), dtype),
        grid=grid,
        in_specs=[pl.BlockSpec((tile_rows, lanes), lambda i: (i, 0))],
        out_specs=pl.BlockSpec((tile_rows, lanes), lambda i: (i, 0)),
        compiler_params=pltpu.CompilerParams(
            dimension_semantics=("parallel",),
            vmem_limit_bytes=vmem_limit,
        ),
        cost_estimate=pl.CostEstimate(
            flops=2 * total,
            transcendentals=0,
            bytes_accessed=2 * rows * lanes * itemsize,
        ),
        input_output_aliases=({0: 0} if (donate and not needs_pad) else {}),
    )(x2d)

    out = out2d
    if needs_pad:
        out = out2d.reshape(-1)[:total]
    return out.reshape(orig_shape)


if __name__ == "__main__":
    key = jax.random.PRNGKey(0)

    # Small NCHW input consistent with a conv-style EEG ResNet block.
    # force_pallas so the Pallas kernel (not the tiny-tensor XLA bypass) runs.
    N, C, H, W = 2, 4, 16, 16
    x = jax.random.normal(key, (N, C, H, W), dtype=jnp.float32)
    # in_channels != out_channels exercises the "should_apply_shortcut" branch,
    # which is still Identity in this module, so the math is unchanged.
    y = residual_block_forward(x, in_channels=4, out_channels=8,
                               activation="relu", force_pallas=True)
    y = jax.block_until_ready(y)
    y_ref = jnp.maximum(2.0 * x, 0.0)
    assert y.shape == x.shape and y.dtype == x.dtype
    assert jnp.allclose(y, y_ref, atol=1e-6), "mismatch vs reference (small input)"

    # Multi-block path: grid >= 2 and evenly split (v7x dual-TC friendly).
    x2 = jax.random.normal(jax.random.PRNGKey(1), (4, 16, 64, 128), dtype=jnp.float32)
    y2 = jax.block_until_ready(
        residual_block_forward(x2, in_channels=16, out_channels=16))
    assert jnp.allclose(y2, jnp.maximum(2.0 * x2, 0.0), atol=1e-6), \
        "mismatch vs reference (tiled input)"

    # Element count not divisible by 128 -> rare pad fallback path.
    x3 = jax.random.normal(jax.random.PRNGKey(2), (2, 3, 5, 7), dtype=jnp.float32)
    y3 = jax.block_until_ready(
        residual_block_forward(x3, in_channels=3, out_channels=3, force_pallas=True))
    assert jnp.allclose(y3, jnp.maximum(2.0 * x3, 0.0), atol=1e-6), \
        "mismatch vs reference (padded input)"

    print("KERNEL_OK")
</pallas_src>

<mosaic_0001>
module attributes {stable_mosaic.version = 11 : i64} {
  func.func @_residual_block_kernel(%arg0: i32, %arg1: memref<8x256xf32, #tpu.memory_space<vmem>>, %arg2: memref<8x256xf32, #tpu.memory_space<vmem>>) attributes {dimension_semantics = [#tpu.dimension_semantics<parallel>], iteration_bounds = array<i64: 1>, scalar_prefetch = 0 : i64, scratch_operands = 0 : i64, tpu.core_type = #tpu.core_type<tc>, window_params = [{transform_indices = @transform_0, window_bounds = array<i64: 8, 256>}, {transform_indices = @transform_1, window_bounds = array<i64: 8, 256>}]} {
    %c0 = arith.constant 0 : index
    %c0_0 = arith.constant 0 : index
    %0 = vector.load %arg1[%c0, %c0_0] : memref<8x256xf32, #tpu.memory_space<vmem>>, vector<8x256xf32>
    %1 = arith.addf %0, %0 : vector<8x256xf32>
    %cst = arith.constant 0.000000e+00 : f32
    %2 = vector.broadcast %cst : f32 to vector<8x256xf32>
    %3 = arith.maximumf %1, %2 : vector<8x256xf32>
    %c0_1 = arith.constant 0 : index
    %c0_2 = arith.constant 0 : index
    %4 = vector.load %arg2[%c0_1, %c0_2] : memref<8x256xf32, #tpu.memory_space<vmem>>, vector<8x256xf32>
    tpu.vector_store %arg2[%c0_1, %c0_2], %3 {strides = array<i32>} : memref<8x256xf32, #tpu.memory_space<vmem>>, vector<8x256xf32>,
    return
  }
  func.func @transform_0(%arg0: i32) -> (i32, i32) {
    %c0_i32 = arith.constant 0 : i32
    %c0_i32_0 = arith.constant 0 : i32
    return %arg0, %c0_i32 : i32, i32
  }
  func.func @transform_1(%arg0: i32) -> (i32, i32) {
    %c0_i32 = arith.constant 0 : i32
    %c0_i32_0 = arith.constant 0 : i32
    return %arg0, %c0_i32 : i32, i32
  }
}

</mosaic_0001>

<bundles_post_ra>
// kernel: tpu_custom_call.1
= control target key start
LH: loop header
LB: loop body
LE: loop exit
PB: predicated region body
PF: predicated region fallthrough
CT: control target
= control target key end

     0   :  { %6 = vsyncpa [#allocation3], 0  ;;  %s130_s0 = inlined_call_operand.hbm [shape: f32[8,256], index: 0, kind: input, shape index: {}]   ;;  %s131_s1 = inlined_call_operand.hbm [shape: f32[8,256], index: 1, kind: output, shape index: {}]  }
   0x1   :  { %7 = vsyncpa [#allocation4], 0  ;;  %s94_s6 = smov [#allocation2]   ;;  %s46_s10 = scalar_lea.hbm %s130_s0, 256 }
   0x2   :  { %s14_s7 = sshll.u32 %s94_s6, 4  ;;  %p47_p0 = scmp.ne.s32.totalorder %s130_s0, %s46_s10  ;;  %s15_s7 = int_to_ptr.vmem [resolvable:$true] %s14_s7 }
   0x3   :  { %p50_p1 = scmp.lt.u32.totalorder %s46_s10, %s130_s0 }
   0x5   :  { %p52_p2 = pnand %p50_p1, %p47_p0 }
   0x7   :  { %55 = shalt.err (!%p52_p2)
}
   0x8   :  { %s56_s15 = scalar_lea.vmem %s15_s7, 256  ;;  %p61_p4 = scmp.lt.s32.totalorder %s15_s7, %s15_s7 }
   0x9   :  { %p57_p3 = scmp.ne.s32.totalorder %s15_s7, %s56_s15  ;;  %p62_p5 = scmp.lt.s32.totalorder %s56_s15, %s56_s15 }
   0xb   :  { %p63_p6 = por %p62_p5, %p61_p4 }
   0xd   :  { %p64_p7 = pnand %p63_p6, %p57_p3 }
   0xf   :  { %67 = shalt.err (!%p64_p7)
}
  0x10   :  { %17 = dma.hbm_to_vmem [thread:$0]  %s130_s0, 256, %s15_s7, [#allocation3]  }
  0x11   :  { %90 = dma.done.wait [#allocation3], 256  }
  0x12   :  { %91 = vsyncadd [#allocation3], 4294967040  ;;  %v21_v0 = vld [vmem:[#allocation2] sm:$0xff]  ;;  %v22_v1 = vld [vmem:[#allocation2 + $0x8] sm:$0xff]  ;;  %s95_s18 = smov [#allocation5]  }
  0x13   :  { %s35_s19 = sshll.u32 %s95_s18, 4  ;;  %v23_v2 = vadd.f32 %v21_v0, %v21_v0  ;;  %v24_v3 = vadd.f32 %v22_v1, %v22_v1  ;;  %s36_s19 = int_to_ptr.vmem [resolvable:$true] %s35_s19 }
  0x14   :  { %s68_s20 = scalar_lea.vmem %s36_s19, 256  ;;  %p73_p9 = scmp.lt.s32.totalorder %s36_s19, %s36_s19 }
  0x15   :  { %v25_v4 = vmax.f32 %v23_v2, 0.0  ;;  %v26_v5 = vmax.f32 %v24_v3, 0.0  ;;  %p69_p8 = scmp.ne.s32.totalorder %s36_s19, %s68_s20  ;;  %p74_p10 = scmp.lt.s32.totalorder %s68_s20, %s68_s20 }
  0x17   :  { %27 = vst [vmem:[#allocation5] sm:$0xff] %v25_v4  ;;  %28 = vst [vmem:[#allocation5 + $0x8] sm:$0xff] %v26_v5  ;;  %p75_p11 = por %p74_p10, %p73_p9 }
  0x19   :  { %p76_p12 = pnand %p75_p11, %p69_p8 }
  0x1b   :  { %79 = shalt.err (!%p76_p12)
}
  0x1c   :  { %s80_s22 = scalar_lea.hbm %s131_s1, 256 }
  0x1d   :  { %p81_p13 = scmp.ne.s32.totalorder %s131_s1, %s80_s22  ;;  %p84_p0 = scmp.lt.u32.totalorder %s80_s22, %s131_s1 }
  0x1f   :  { %p86_p1 = pnand %p84_p0, %p81_p13 }
  0x21   :  { %89 = shalt.err (!%p86_p1)
}
  0x22   :  { %38 = dma.vmem_to_hbm [thread:$0]  %s36_s19, 256, %s131_s1, [#allocation4]  }
  0x23   :  { %92 = dma.done.wait [#allocation4], 256  }
  0x24   :  { %93 = vsyncadd [#allocation4], 4294967040 }
  0x25   :  { %42 = vsyncpa [#allocation3], 1 }
  0x26   :  { %43 = vsyncpa [#allocation4], 1 }

</bundles_post_ra>
